<compile_context>
chip_gen: v6e
topology: v6e:2x2x1
jax: 0.10.0
libtpu: 0.0.40
codegen_flags: <defaults>
</compile_context>

<pallas_src>
import functools
import math

import jax
import jax.numpy as jnp
import numpy as np
from jax import lax
from jax.experimental import pallas as pl
from jax.experimental.pallas import tpu as pltpu

SCALE = math.sqrt(0.5)  # torch.sqrt(FloatTensor([0.5]))


# --------------------------------------------------------------------------
# Fused encoder kernel (one grid step == TB batch elements, TM = TB*L rows)
# --------------------------------------------------------------------------
def _encoder_fused_kernel(emb_ref, w_e2h_ref, b_e2h_ref,
                          wv_ref, wg_ref, bv_ref, bg_ref,
                          w_h2e_ref, b_h2e_ref,
                          conved_ref, combined_ref,
                          xpad_ref,
                          *, n_layers, kernel_size, tb, seq_len):
    K = kernel_size
    pad = (K - 1) // 2
    L = seq_len
    H = w_e2h_ref.shape[1]
    TM = tb * L
    cdt = xpad_ref.dtype                        # matmul operand dtype (bf16/f32)

    # ---- streamed activations for this batch tile (compute dtype) ----
    emb = emb_ref[...]                          # (TM, E)

    # ---- emb2hid: (TM, E) @ (E, H), f32 accumulate ----
    x = jnp.dot(emb, w_e2h_ref[...],
                preferred_element_type=jnp.float32) + b_e2h_ref[...]   # (TM, H) f32

    # ---- zero ONLY the K-1 halo slabs (interior is rewritten each layer). ----
    if pad > 0:
        xpad_ref[:, :pad, :] = jnp.zeros((tb, pad, H), cdt)
        xpad_ref[:, pad + L:, :] = jnp.zeros((tb, K - 1 - pad, H), cdt)

    def conv_glu_layer(x, wv_l, wg_l, bv_l, bg_l):
        # Write the current activation into the padded-scratch interior so the
        # K shifted tap reads below see it (halo stays zero == PyTorch padding).
        xpad_ref[:, pad:pad + L, :] = x.reshape(tb, L, H).astype(cdt)
        # K per-tap matmuls, f32 accumulation (no im2col concat / relayout).
        val = None
        gate = None
        for k in range(K):                      # static unroll over taps
            tap = xpad_ref[:, k:k + L, :].reshape(TM, H)           # cdt
            dv = jnp.dot(tap, wv_l[k], preferred_element_type=jnp.float32)
            dg = jnp.dot(tap, wg_l[k], preferred_element_type=jnp.float32)
            val = dv if val is None else val + dv
            gate = dg if gate is None else gate + dg
        val = val + bv_l                        # (1, H) broadcast
        gate = gate + bg_l
        glu = val * jax.nn.sigmoid(gate)        # GLU epilogue in f32 (VPU+EUP)
        return (glu + x) * SCALE                # residual from the LIVE value

    if n_layers <= 8:
        # Static unroll for small fixed depths (LLO scheduler visibility).
        for layer in range(n_layers):
            x = conv_glu_layer(x, wv_ref[layer], wg_ref[layer],
                               bv_ref[layer], bg_ref[layer])
    else:
        # Deep stacks: bound live ranges / code size with a real loop.
        def body(layer, xc):
            return conv_glu_layer(xc, wv_ref[layer], wg_ref[layer],
                                  bv_ref[layer], bg_ref[layer])
        x = lax.fori_loop(0, n_layers, body, x)

    # ---- hid2emb + combine ----
    conved = jnp.dot(x.astype(cdt), w_h2e_ref[...],
                     preferred_element_type=jnp.float32) + b_h2e_ref[...]  # (TM, E)
    conved_ref[...] = conved.astype(conved_ref.dtype)
    combined_ref[...] = ((conved + emb.astype(jnp.float32)) * SCALE
                         ).astype(combined_ref.dtype)


# --------------------------------------------------------------------------
# Wrapper: embedding glue + single fused pallas_call
# --------------------------------------------------------------------------
def encoder_forward(src, params, kernel_size, compute_dtype=jnp.bfloat16):
    assert kernel_size % 2 == 1, "Kernel size must be odd!"
    B, L = src.shape
    # Embedding lookups (gather glue).  Dropout == identity (inference).
    tok_emb = params["tok_embedding"][src]                      # (B, L, E)
    pos_emb = params["pos_embedding"][jnp.arange(L)][None]      # (1, L, E)
    embedded = tok_emb + pos_emb                                # (B, L, E) f32

    E = embedded.shape[-1]
    H = params["emb2hid_w"].shape[1]
    K = kernel_size
    n_layers = params["conv_wv"].shape[0]
    cdt = compute_dtype

    # Stream activations in the compute dtype (halves input DMA bytes for bf16).
    emb_in = embedded.astype(cdt)

    # ---- batch tiling ----
    TB = max(1, min(B, pl.cdiv(1024, L)))       # target ~1K matmul rows / step
    if B >= 2 and pl.cdiv(B, TB) < 2:
        TB = max(1, pl.cdiv(B, 2))              # >=2 grid steps (v7x: 2 TCs)

    # Crude per-step VMEM footprint (double-buffered streamed I/O + scratch +
    # resident weights); shrink TB to fit a v7x-safe budget.
    def _footprint(tb):
        tm = tb * L
        item = jnp.dtype(cdt).itemsize
        act = 2 * tm * E * item                              # input, 2 buffers
        out = 2 * 2 * tm * E * 4                             # two f32 outputs
        scr = tb * (L + K - 1) * H * item                    # padded scratch
        wts = 2 * (E * H + H * E + 2 * n_layers * K * H * H) * item \
            + 2 * (H + E + 2 * n_layers * H) * 4             # weights + biases
        return act + out + scr + wts

    VMEM_BUDGET = 40 * 1024 * 1024
    while TB > 1 and _footprint(TB) > VMEM_BUDGET:
        TB = max(1, TB // 2)
    # Keep TM = TB*L sublane-friendly (multiple of 8) when not the full array.
    while TB > 1 and (TB * L) % 8 != 0:
        TB -= 1
    if (TB * L) % 8 != 0:
        TB = B                                  # block == full array dim: legal

    Bp = pl.cdiv(B, TB) * TB
    if Bp != B:
        emb_in = jnp.pad(emb_in, ((0, Bp - B), (0, 0), (0, 0)))
    emb2d = emb_in.reshape(Bp * L, E)
    TM = TB * L

    w_e2h = params["emb2hid_w"].astype(cdt)                     # (E, H)
    w_h2e = params["hid2emb_w"].astype(cdt)                     # (H, E)
    b_e2h = params["emb2hid_b"].reshape(1, H).astype(jnp.float32)
    b_h2e = params["hid2emb_b"].reshape(1, E).astype(jnp.float32)
    wv_all = params["conv_wv"].astype(cdt)                      # (n_layers, K, H, H)
    wg_all = params["conv_wg"].astype(cdt)                      # (n_layers, K, H, H)
    bv_all = params["conv_bv"].astype(jnp.float32)              # (n_layers, 1, H)
    bg_all = params["conv_bg"].astype(jnp.float32)              # (n_layers, 1, H)

    kernel = functools.partial(_encoder_fused_kernel,
                               n_layers=n_layers, kernel_size=K,
                               tb=TB, seq_len=L)

    conved2d, combined2d = pl.pallas_call(
        kernel,
        grid=(Bp // TB,),
        out_shape=(jax.ShapeDtypeStruct((Bp * L, E), jnp.float32),
                   jax.ShapeDtypeStruct((Bp * L, E), jnp.float32)),
        in_specs=[
            pl.BlockSpec((TM, E), lambda i: (i, 0)),                    # streamed activations
            pl.BlockSpec((E, H), lambda i: (0, 0)),                     # resident weights
            pl.BlockSpec((1, H), lambda i: (0, 0)),
            pl.BlockSpec((n_layers, K, H, H), lambda i: (0, 0, 0, 0)),
            pl.BlockSpec((n_layers, K, H, H), lambda i: (0, 0, 0, 0)),
            pl.BlockSpec((n_layers, 1, H), lambda i: (0, 0, 0)),
            pl.BlockSpec((n_layers, 1, H), lambda i: (0, 0, 0)),
            pl.BlockSpec((H, E), lambda i: (0, 0)),
            pl.BlockSpec((1, E), lambda i: (0, 0)),
        ],
        out_specs=(pl.BlockSpec((TM, E), lambda i: (i, 0)),
                   pl.BlockSpec((TM, E), lambda i: (i, 0))),
        scratch_shapes=[pltpu.VMEM((TB, L + K - 1, H), cdt)],
        compiler_params=pltpu.CompilerParams(
            dimension_semantics=("parallel",),
            vmem_limit_bytes=48 * 1024 * 1024),
    )(emb2d, w_e2h, b_e2h, wv_all, wg_all, bv_all, bg_all, w_h2e, b_h2e)

    conved = conved2d.reshape(Bp, L, E)[:B]
    combined = combined2d.reshape(Bp, L, E)[:B]
    return conved, combined


# --------------------------------------------------------------------------
# Pure-JAX reference reproducing PyTorch semantics (NCL conv via lax.conv).
# --------------------------------------------------------------------------
def encoder_reference(src, params, kernel_size):
    B, L = src.shape
    tok_emb = params["tok_embedding"][src]
    pos_emb = params["pos_embedding"][jnp.arange(L)][None]
    embedded = tok_emb + pos_emb
    conv_input = embedded @ params["emb2hid_w"] + params["emb2hid_b"]
    H = conv_input.shape[-1]
    pad = (kernel_size - 1) // 2

    x = jnp.transpose(conv_input, (0, 2, 1))                     # (B, H, L)
    for w_oik, b in zip(params["conv_w_oik"], params["conv_b"]):
        conved = lax.conv_general_dilated(
            x, w_oik, window_strides=(1,), padding=[(pad, pad)],
            dimension_numbers=("NCH", "OIH", "NCH")) + b[None, :, None]
        glu = conved[:, :H] * jax.nn.sigmoid(conved[:, H:])
        x = (glu + x) * SCALE
    conved = jnp.transpose(x, (0, 2, 1)) @ params["hid2emb_w"] + params["hid2emb_b"]
    combined = (conved + embedded) * SCALE
    return conved, combined


# --------------------------------------------------------------------------
# Deterministic parameter construction
# --------------------------------------------------------------------------
def make_params(key, input_dim, emb_dim, hid_dim, n_layers, kernel_size,
                max_length):
    keys = jax.random.split(key, 6 + 2 * n_layers)
    p = {}
    p["tok_embedding"] = 0.1 * jax.random.normal(keys[0], (input_dim, emb_dim), jnp.float32)
    p["pos_embedding"] = 0.1 * jax.random.normal(keys[1], (max_length, emb_dim), jnp.float32)
    p["emb2hid_w"] = jax.random.normal(keys[2], (emb_dim, hid_dim), jnp.float32) / math.sqrt(emb_dim)
    p["emb2hid_b"] = 0.1 * jax.random.normal(keys[3], (hid_dim,), jnp.float32)
    p["hid2emb_w"] = jax.random.normal(keys[4], (hid_dim, emb_dim), jnp.float32) / math.sqrt(hid_dim)
    p["hid2emb_b"] = 0.1 * jax.random.normal(keys[5], (emb_dim,), jnp.float32)

    conv_w_oik, conv_b = [], []
    wv_list, wg_list, bv_list, bg_list = [], [], [], []
    for i in range(n_layers):
        w = jax.random.normal(keys[6 + 2 * i], (2 * hid_dim, hid_dim, kernel_size),
                              jnp.float32) / math.sqrt(hid_dim * kernel_size)
        b = 0.1 * jax.random.normal(keys[7 + 2 * i], (2 * hid_dim,), jnp.float32)
        conv_w_oik.append(w)                                   # PyTorch [O, I, K]
        conv_b.append(b)
        # Split GLU halves (value = out-channels [:H], gate = [H:]) and lay out
        # as per-tap matmul weights: wv[k, i, o] = W[o, i, k]  -> (K, H, H).
        wv = jnp.transpose(w[:hid_dim], (2, 1, 0))
        wg = jnp.transpose(w[hid_dim:], (2, 1, 0))
        wv_list.append(wv)
        wg_list.append(wg)
        bv_list.append(b[:hid_dim].reshape(1, hid_dim))
        bg_list.append(b[hid_dim:].reshape(1, hid_dim))
    p["conv_w_oik"] = conv_w_oik
    p["conv_b"] = conv_b
    p["conv_wv"] = jnp.stack(wv_list)        # (n_layers, K, H, H)
    p["conv_wg"] = jnp.stack(wg_list)        # (n_layers, K, H, H)
    p["conv_bv"] = jnp.stack(bv_list)        # (n_layers, 1, H)
    p["conv_bg"] = jnp.stack(bg_list)        # (n_layers, 1, H)
    return p


if __name__ == "__main__":
    # Small shapes consistent with the module's forward.
    INPUT_DIM, EMB_DIM, HID_DIM = 50, 32, 32
    N_LAYERS, KERNEL_SIZE, MAX_LEN = 2, 3, 100
    B, L = 2, 8

    key = jax.random.PRNGKey(0)
    k_params, k_src = jax.random.split(key)
    params = make_params(k_params, INPUT_DIM, EMB_DIM, HID_DIM,
                         N_LAYERS, KERNEL_SIZE, MAX_LEN)
    src = jax.random.randint(k_src, (B, L), 0, INPUT_DIM, dtype=jnp.int32)

    conved_ref, combined_ref = encoder_reference(src, params, KERNEL_SIZE)

    # 1) f32 compute path: tight check against the PyTorch-semantics reference.
    conved_f32, combined_f32 = encoder_forward(src, params, KERNEL_SIZE,
                                               compute_dtype=jnp.float32)
    conved_f32 = jax.block_until_ready(conved_f32)
    combined_f32 = jax.block_until_ready(combined_f32)
    np.testing.assert_allclose(np.asarray(conved_f32), np.asarray(conved_ref),
                               rtol=1e-4, atol=1e-4)
    np.testing.assert_allclose(np.asarray(combined_f32), np.asarray(combined_ref),
                               rtol=1e-4, atol=1e-4)

    # 2) bf16-operand / f32-accumulate path (default, per perf guidance).
    conved_bf, combined_bf = encoder_forward(src, params, KERNEL_SIZE,
                                             compute_dtype=jnp.bfloat16)
    conved_bf = jax.block_until_ready(conved_bf)
    combined_bf = jax.block_until_ready(combined_bf)
    np.testing.assert_allclose(np.asarray(conved_bf), np.asarray(conved_ref),
                               rtol=5e-2, atol=3e-2)
    np.testing.assert_allclose(np.asarray(combined_bf), np.asarray(combined_ref),
                               rtol=5e-2, atol=3e-2)

    print("KERNEL_OK")
</pallas_src>

<mosaic_0001>
module attributes {stable_mosaic.version = 11 : i64} {
  func.func @_encoder_fused_kernel(%arg0: i32, %arg1: memref<8x32xf32, #tpu.memory_space<vmem>>, %arg2: memref<32x32xf32, #tpu.memory_space<vmem>>, %arg3: memref<1x32xf32, #tpu.memory_space<vmem>>, %arg4: memref<2x3x32x32xf32, #tpu.memory_space<vmem>>, %arg5: memref<2x3x32x32xf32, #tpu.memory_space<vmem>>, %arg6: memref<2x1x32xf32, #tpu.memory_space<vmem>>, %arg7: memref<2x1x32xf32, #tpu.memory_space<vmem>>, %arg8: memref<32x32xf32, #tpu.memory_space<vmem>>, %arg9: memref<1x32xf32, #tpu.memory_space<vmem>>, %arg10: memref<8x32xf32, #tpu.memory_space<vmem>>, %arg11: memref<8x32xf32, #tpu.memory_space<vmem>>, %arg12: memref<1x10x32xf32, #tpu.memory_space<vmem>>) attributes {dimension_semantics = [#tpu.dimension_semantics<parallel>], iteration_bounds = array<i64: 2>, scalar_prefetch = 0 : i64, scratch_operands = 1 : i64, tpu.core_type = #tpu.core_type<tc>, window_params = [{transform_indices = @transform_0, window_bounds = array<i64: 8, 32>}, {pipeline_mode = #tpu.pipeline_mode<synchronous>, transform_indices = @transform_1, window_bounds = array<i64: 32, 32>}, {pipeline_mode = #tpu.pipeline_mode<synchronous>, transform_indices = @transform_2, window_bounds = array<i64: 1, 32>}, {pipeline_mode = #tpu.pipeline_mode<synchronous>, transform_indices = @transform_3, window_bounds = array<i64: 2, 3, 32, 32>}, {pipeline_mode = #tpu.pipeline_mode<synchronous>, transform_indices = @transform_4, window_bounds = array<i64: 2, 3, 32, 32>}, {pipeline_mode = #tpu.pipeline_mode<synchronous>, transform_indices = @transform_5, window_bounds = array<i64: 2, 1, 32>}, {pipeline_mode = #tpu.pipeline_mode<synchronous>, transform_indices = @transform_6, window_bounds = array<i64: 2, 1, 32>}, {pipeline_mode = #tpu.pipeline_mode<synchronous>, transform_indices = @transform_7, window_bounds = array<i64: 32, 32>}, {pipeline_mode = #tpu.pipeline_mode<synchronous>, transform_indices = @transform_8, window_bounds = array<i64: 1, 32>}, {transform_indices = @transform_9, window_bounds = array<i64: 8, 32>}, {transform_indices = @transform_10, window_bounds = array<i64: 8, 32>}]} {
    %c0 = arith.constant 0 : index
    %c0_0 = arith.constant 0 : index
    %0 = vector.load %arg1[%c0, %c0_0] : memref<8x32xf32, #tpu.memory_space<vmem>>, vector<8x32xf32>
    %c0_1 = arith.constant 0 : index
    %c0_2 = arith.constant 0 : index
    %1 = vector.load %arg2[%c0_1, %c0_2] : memref<32x32xf32, #tpu.memory_space<vmem>>, vector<32x32xf32>
    %cst = arith.constant dense<0.000000e+00> : vector<8x32xf32>
    %2 = tpu.matmul %0, %1, %cst {dimension_numbers = #tpu.dot_dimension_numbers<[1], [0], [0], [1], [0, 0, 1, 1], [], []>} : vector<8x32xf32>, vector<32x32xf32>, vector<8x32xf32> -> vector<8x32xf32>
    %c0_3 = arith.constant 0 : index
    %c0_4 = arith.constant 0 : index
    %3 = vector.load %arg3[%c0_3, %c0_4] : memref<1x32xf32, #tpu.memory_space<vmem>>, vector<1x32xf32>
    %4 = vector.broadcast %3 : vector<1x32xf32> to vector<8x32xf32>
    %5 = arith.addf %2, %4 : vector<8x32xf32>
    %cst_5 = arith.constant 0.000000e+00 : f32
    %6 = vector.broadcast %cst_5 : f32 to vector<1x1x32xf32>
    %c0_6 = arith.constant 0 : index
    %c0_7 = arith.constant 0 : index
    %c0_8 = arith.constant 0 : index
    %7 = vector.load %arg12[%c0_6, %c0_7, %c0_8] : memref<1x10x32xf32, #tpu.memory_space<vmem>>, vector<1x1x32xf32>
    tpu.vector_store %arg12[%c0_6, %c0_7, %c0_8], %6 {strides = array<i32>} : memref<1x10x32xf32, #tpu.memory_space<vmem>>, vector<1x1x32xf32>,
    %cst_9 = arith.constant 0.000000e+00 : f32
    %8 = vector.broadcast %cst_9 : f32 to vector<1x1x32xf32>
    %c0_10 = arith.constant 0 : index
    %c9 = arith.constant 9 : index
    %c0_11 = arith.constant 0 : index
    %9 = vector.load %arg12[%c0_10, %c9, %c0_11] : memref<1x10x32xf32, #tpu.memory_space<vmem>>, vector<1x1x32xf32>
    tpu.vector_store %arg12[%c0_10, %c9, %c0_11], %8 {strides = array<i32>} : memref<1x10x32xf32, #tpu.memory_space<vmem>>, vector<1x1x32xf32>,
    %c0_12 = arith.constant 0 : index
    %c0_13 = arith.constant 0 : index
    %c0_14 = arith.constant 0 : index
    %c0_15 = arith.constant 0 : index
    %10 = vector.load %arg4[%c0_12, %c0_13, %c0_14, %c0_15] : memref<2x3x32x32xf32, #tpu.memory_space<vmem>>, vector<1x3x32x32xf32>
    %11 = vector.shape_cast %10 : vector<1x3x32x32xf32> to vector<3x32x32xf32>
    %c0_16 = arith.constant 0 : index
    %c0_17 = arith.constant 0 : index
    %c0_18 = arith.constant 0 : index
    %c0_19 = arith.constant 0 : index
    %12 = vector.load %arg5[%c0_16, %c0_17, %c0_18, %c0_19] : memref<2x3x32x32xf32, #tpu.memory_space<vmem>>, vector<1x3x32x32xf32>
    %13 = vector.shape_cast %12 : vector<1x3x32x32xf32> to vector<3x32x32xf32>
    %c0_20 = arith.constant 0 : index
    %c0_21 = arith.constant 0 : index
    %c0_22 = arith.constant 0 : index
    %14 = vector.load %arg6[%c0_20, %c0_21, %c0_22] : memref<2x1x32xf32, #tpu.memory_space<vmem>>, vector<1x1x32xf32>
    %15 = vector.shape_cast %14 : vector<1x1x32xf32> to vector<1x32xf32>
    %c0_23 = arith.constant 0 : index
    %c0_24 = arith.constant 0 : index
    %c0_25 = arith.constant 0 : index
    %16 = vector.load %arg7[%c0_23, %c0_24, %c0_25] : memref<2x1x32xf32, #tpu.memory_space<vmem>>, vector<1x1x32xf32>
    %17 = vector.shape_cast %16 : vector<1x1x32xf32> to vector<1x32xf32>
    %18 = vector.shape_cast %5 : vector<8x32xf32> to vector<1x8x32xf32>
    %c0_26 = arith.constant 0 : index
    %c1 = arith.constant 1 : index
    %c0_27 = arith.constant 0 : index
    %19 = vector.load %arg12[%c0_26, %c1, %c0_27] : memref<1x10x32xf32, #tpu.memory_space<vmem>>, vector<1x8x32xf32>
    tpu.vector_store %arg12[%c0_26, %c1, %c0_27], %18 {strides = array<i32>} : memref<1x10x32xf32, #tpu.memory_space<vmem>>, vector<1x8x32xf32>,
    %c0_28 = arith.constant 0 : index
    %c0_29 = arith.constant 0 : index
    %c0_30 = arith.constant 0 : index
    %20 = vector.load %arg12[%c0_28, %c0_29, %c0_30] : memref<1x10x32xf32, #tpu.memory_space<vmem>>, vector<1x8x32xf32>
    %21 = vector.shape_cast %20 : vector<1x8x32xf32> to vector<8x32xf32>
    %22 = vector.extract_strided_slice %11 {offsets = [0, 0, 0], sizes = [1, 32, 32], strides = [1, 1, 1]} : vector<3x32x32xf32> to vector<1x32x32xf32>
    %23 = vector.shape_cast %22 : vector<1x32x32xf32> to vector<32x32xf32>
    %cst_31 = arith.constant dense<0.000000e+00> : vector<8x32xf32>
    %24 = tpu.matmul %21, %23, %cst_31 {dimension_numbers = #tpu.dot_dimension_numbers<[1], [0], [0], [1], [0, 0, 1, 1], [], []>} : vector<8x32xf32>, vector<32x32xf32>, vector<8x32xf32> -> vector<8x32xf32>
    %25 = vector.extract_strided_slice %13 {offsets = [0, 0, 0], sizes = [1, 32, 32], strides = [1, 1, 1]} : vector<3x32x32xf32> to vector<1x32x32xf32>
    %26 = vector.shape_cast %25 : vector<1x32x32xf32> to vector<32x32xf32>
    %cst_32 = arith.constant dense<0.000000e+00> : vector<8x32xf32>
    %27 = tpu.matmul %21, %26, %cst_32 {dimension_numbers = #tpu.dot_dimension_numbers<[1], [0], [0], [1], [0, 0, 1, 1], [], []>} : vector<8x32xf32>, vector<32x32xf32>, vector<8x32xf32> -> vector<8x32xf32>
    %c0_33 = arith.constant 0 : index
    %c1_34 = arith.constant 1 : index
    %c0_35 = arith.constant 0 : index
    %28 = vector.load %arg12[%c0_33, %c1_34, %c0_35] : memref<1x10x32xf32, #tpu.memory_space<vmem>>, vector<1x8x32xf32>
    %29 = vector.shape_cast %28 : vector<1x8x32xf32> to vector<8x32xf32>
    %30 = vector.extract_strided_slice %11 {offsets = [1, 0, 0], sizes = [1, 32, 32], strides = [1, 1, 1]} : vector<3x32x32xf32> to vector<1x32x32xf32>
    %31 = vector.shape_cast %30 : vector<1x32x32xf32> to vector<32x32xf32>
    %cst_36 = arith.constant dense<0.000000e+00> : vector<8x32xf32>
    %32 = tpu.matmul %29, %31, %cst_36 {dimension_numbers = #tpu.dot_dimension_numbers<[1], [0], [0], [1], [0, 0, 1, 1], [], []>} : vector<8x32xf32>, vector<32x32xf32>, vector<8x32xf32> -> vector<8x32xf32>
    %33 = vector.extract_strided_slice %13 {offsets = [1, 0, 0], sizes = [1, 32, 32], strides = [1, 1, 1]} : vector<3x32x32xf32> to vector<1x32x32xf32>
    %34 = vector.shape_cast %33 : vector<1x32x32xf32> to vector<32x32xf32>
    %cst_37 = arith.constant dense<0.000000e+00> : vector<8x32xf32>
    %35 = tpu.matmul %29, %34, %cst_37 {dimension_numbers = #tpu.dot_dimension_numbers<[1], [0], [0], [1], [0, 0, 1, 1], [], []>} : vector<8x32xf32>, vector<32x32xf32>, vector<8x32xf32> -> vector<8x32xf32>
    %36 = arith.addf %24, %32 : vector<8x32xf32>
    %37 = arith.addf %27, %35 : vector<8x32xf32>
    %c0_38 = arith.constant 0 : index
    %c2 = arith.constant 2 : index
    %c0_39 = arith.constant 0 : index
    %38 = vector.load %arg12[%c0_38, %c2, %c0_39] : memref<1x10x32xf32, #tpu.memory_space<vmem>>, vector<1x8x32xf32>
    %39 = vector.shape_cast %38 : vector<1x8x32xf32> to vector<8x32xf32>
    %40 = vector.extract_strided_slice %11 {offsets = [2, 0, 0], sizes = [1, 32, 32], strides = [1, 1, 1]} : vector<3x32x32xf32> to vector<1x32x32xf32>
    %41 = vector.shape_cast %40 : vector<1x32x32xf32> to vector<32x32xf32>
    %cst_40 = arith.constant dense<0.000000e+00> : vector<8x32xf32>
    %42 = tpu.matmul %39, %41, %cst_40 {dimension_numbers = #tpu.dot_dimension_numbers<[1], [0], [0], [1], [0, 0, 1, 1], [], []>} : vector<8x32xf32>, vector<32x32xf32>, vector<8x32xf32> -> vector<8x32xf32>
    %43 = vector.extract_strided_slice %13 {offsets = [2, 0, 0], sizes = [1, 32, 32], strides = [1, 1, 1]} : vector<3x32x32xf32> to vector<1x32x32xf32>
    %44 = vector.shape_cast %43 : vector<1x32x32xf32> to vector<32x32xf32>
    %cst_41 = arith.constant dense<0.000000e+00> : vector<8x32xf32>
    %45 = tpu.matmul %39, %44, %cst_41 {dimension_numbers = #tpu.dot_dimension_numbers<[1], [0], [0], [1], [0, 0, 1, 1], [], []>} : vector<8x32xf32>, vector<32x32xf32>, vector<8x32xf32> -> vector<8x32xf32>
    %46 = arith.addf %36, %42 : vector<8x32xf32>
    %47 = arith.addf %37, %45 : vector<8x32xf32>
    %48 = vector.broadcast %15 : vector<1x32xf32> to vector<8x32xf32>
    %49 = arith.addf %46, %48 : vector<8x32xf32>
    %50 = vector.broadcast %17 : vector<1x32xf32> to vector<8x32xf32>
    %51 = arith.addf %47, %50 : vector<8x32xf32>
    %52 = arith.negf %51 : vector<8x32xf32>
    %53 = math.exp %52 : vector<8x32xf32>
    %cst_42 = arith.constant 1.000000e+00 : f32
    %54 = vector.broadcast %cst_42 : f32 to vector<8x32xf32>
    %55 = arith.addf %54, %53 : vector<8x32xf32>
    %56 = arith.divf %54, %55 : vector<8x32xf32>
    %57 = arith.mulf %49, %56 : vector<8x32xf32>
    %58 = arith.addf %57, %5 : vector<8x32xf32>
    %cst_43 = arith.constant 0.707106769 : f32
    %59 = vector.broadcast %cst_43 : f32 to vector<8x32xf32>
    %60 = arith.mulf %58, %59 : vector<8x32xf32>
    %c1_44 = arith.constant 1 : index
    %c0_45 = arith.constant 0 : index
    %c0_46 = arith.constant 0 : index
    %c0_47 = arith.constant 0 : index
    %61 = vector.load %arg4[%c1_44, %c0_45, %c0_46, %c0_47] : memref<2x3x32x32xf32, #tpu.memory_space<vmem>>, vector<1x3x32x32xf32>
    %62 = vector.shape_cast %61 : vector<1x3x32x32xf32> to vector<3x32x32xf32>
    %c1_48 = arith.constant 1 : index
    %c0_49 = arith.constant 0 : index
    %c0_50 = arith.constant 0 : index
    %c0_51 = arith.constant 0 : index
    %63 = vector.load %arg5[%c1_48, %c0_49, %c0_50, %c0_51] : memref<2x3x32x32xf32, #tpu.memory_space<vmem>>, vector<1x3x32x32xf32>
    %64 = vector.shape_cast %63 : vector<1x3x32x32xf32> to vector<3x32x32xf32>
    %c1_52 = arith.constant 1 : index
    %c0_53 = arith.constant 0 : index
    %c0_54 = arith.constant 0 : index
    %65 = vector.load %arg6[%c1_52, %c0_53, %c0_54] : memref<2x1x32xf32, #tpu.memory_space<vmem>>, vector<1x1x32xf32>
    %66 = vector.shape_cast %65 : vector<1x1x32xf32> to vector<1x32xf32>
    %c1_55 = arith.constant 1 : index
    %c0_56 = arith.constant 0 : index
    %c0_57 = arith.constant 0 : index
    %67 = vector.load %arg7[%c1_55, %c0_56, %c0_57] : memref<2x1x32xf32, #tpu.memory_space<vmem>>, vector<1x1x32xf32>
    %68 = vector.shape_cast %67 : vector<1x1x32xf32> to vector<1x32xf32>
    %69 = vector.shape_cast %60 : vector<8x32xf32> to vector<1x8x32xf32>
    %c0_58 = arith.constant 0 : index
    %c1_59 = arith.constant 1 : index
    %c0_60 = arith.constant 0 : index
    %70 = vector.load %arg12[%c0_58, %c1_59, %c0_60] : memref<1x10x32xf32, #tpu.memory_space<vmem>>, vector<1x8x32xf32>
    tpu.vector_store %arg12[%c0_58, %c1_59, %c0_60], %69 {strides = array<i32>} : memref<1x10x32xf32, #tpu.memory_space<vmem>>, vector<1x8x32xf32>,
    %c0_61 = arith.constant 0 : index
    %c0_62 = arith.constant 0 : index
    %c0_63 = arith.constant 0 : index
    %71 = vector.load %arg12[%c0_61, %c0_62, %c0_63] : memref<1x10x32xf32, #tpu.memory_space<vmem>>, vector<1x8x32xf32>
    %72 = vector.shape_cast %71 : vector<1x8x32xf32> to vector<8x32xf32>
    %73 = vector.extract_strided_slice %62 {offsets = [0, 0, 0], sizes = [1, 32, 32], strides = [1, 1, 1]} : vector<3x32x32xf32> to vector<1x32x32xf32>
    %74 = vector.shape_cast %73 : vector<1x32x32xf32> to vector<32x32xf32>
    %cst_64 = arith.constant dense<0.000000e+00> : vector<8x32xf32>
    %75 = tpu.matmul %72, %74, %cst_64 {dimension_numbers = #tpu.dot_dimension_numbers<[1], [0], [0], [1], [0, 0, 1, 1], [], []>} : vector<8x32xf32>, vector<32x32xf32>, vector<8x32xf32> -> vector<8x32xf32>
    %76 = vector.extract_strided_slice %64 {offsets = [0, 0, 0], sizes = [1, 32, 32], strides = [1, 1, 1]} : vector<3x32x32xf32> to vector<1x32x32xf32>
    %77 = vector.shape_cast %76 : vector<1x32x32xf32> to vector<32x32xf32>
    %cst_65 = arith.constant dense<0.000000e+00> : vector<8x32xf32>
    %78 = tpu.matmul %72, %77, %cst_65 {dimension_numbers = #tpu.dot_dimension_numbers<[1], [0], [0], [1], [0, 0, 1, 1], [], []>} : vector<8x32xf32>, vector<32x32xf32>, vector<8x32xf32> -> vector<8x32xf32>
    %c0_66 = arith.constant 0 : index
    %c1_67 = arith.constant 1 : index
    %c0_68 = arith.constant 0 : index
    %79 = vector.load %arg12[%c0_66, %c1_67, %c0_68] : memref<1x10x32xf32, #tpu.memory_space<vmem>>, vector<1x8x32xf32>
    %80 = vector.shape_cast %79 : vector<1x8x32xf32> to vector<8x32xf32>
    %81 = vector.extract_strided_slice %62 {offsets = [1, 0, 0], sizes = [1, 32, 32], strides = [1, 1, 1]} : vector<3x32x32xf32> to vector<1x32x32xf32>
    %82 = vector.shape_cast %81 : vector<1x32x32xf32> to vector<32x32xf32>
    %cst_69 = arith.constant dense<0.000000e+00> : vector<8x32xf32>
    %83 = tpu.matmul %80, %82, %cst_69 {dimension_numbers = #tpu.dot_dimension_numbers<[1], [0], [0], [1], [0, 0, 1, 1], [], []>} : vector<8x32xf32>, vector<32x32xf32>, vector<8x32xf32> -> vector<8x32xf32>
    %84 = vector.extract_strided_slice %64 {offsets = [1, 0, 0], sizes = [1, 32, 32], strides = [1, 1, 1]} : vector<3x32x32xf32> to vector<1x32x32xf32>
    %85 = vector.shape_cast %84 : vector<1x32x32xf32> to vector<32x32xf32>
    %cst_70 = arith.constant dense<0.000000e+00> : vector<8x32xf32>
    %86 = tpu.matmul %80, %85, %cst_70 {dimension_numbers = #tpu.dot_dimension_numbers<[1], [0], [0], [1], [0, 0, 1, 1], [], []>} : vector<8x32xf32>, vector<32x32xf32>, vector<8x32xf32> -> vector<8x32xf32>
    %87 = arith.addf %75, %83 : vector<8x32xf32>
    %88 = arith.addf %78, %86 : vector<8x32xf32>
    %c0_71 = arith.constant 0 : index
    %c2_72 = arith.constant 2 : index
    %c0_73 = arith.constant 0 : index
    %89 = vector.load %arg12[%c0_71, %c2_72, %c0_73] : memref<1x10x32xf32, #tpu.memory_space<vmem>>, vector<1x8x32xf32>
    %90 = vector.shape_cast %89 : vector<1x8x32xf32> to vector<8x32xf32>
    %91 = vector.extract_strided_slice %62 {offsets = [2, 0, 0], sizes = [1, 32, 32], strides = [1, 1, 1]} : vector<3x32x32xf32> to vector<1x32x32xf32>
    %92 = vector.shape_cast %91 : vector<1x32x32xf32> to vector<32x32xf32>
    %cst_74 = arith.constant dense<0.000000e+00> : vector<8x32xf32>
    %93 = tpu.matmul %90, %92, %cst_74 {dimension_numbers = #tpu.dot_dimension_numbers<[1], [0], [0], [1], [0, 0, 1, 1], [], []>} : vector<8x32xf32>, vector<32x32xf32>, vector<8x32xf32> -> vector<8x32xf32>
    %94 = vector.extract_strided_slice %64 {offsets = [2, 0, 0], sizes = [1, 32, 32], strides = [1, 1, 1]} : vector<3x32x32xf32> to vector<1x32x32xf32>
    %95 = vector.shape_cast %94 : vector<1x32x32xf32> to vector<32x32xf32>
    %cst_75 = arith.constant dense<0.000000e+00> : vector<8x32xf32>
    %96 = tpu.matmul %90, %95, %cst_75 {dimension_numbers = #tpu.dot_dimension_numbers<[1], [0], [0], [1], [0, 0, 1, 1], [], []>} : vector<8x32xf32>, vector<32x32xf32>, vector<8x32xf32> -> vector<8x32xf32>
    %97 = arith.addf %87, %93 : vector<8x32xf32>
    %98 = arith.addf %88, %96 : vector<8x32xf32>
    %99 = vector.broadcast %66 : vector<1x32xf32> to vector<8x32xf32>
    %100 = arith.addf %97, %99 : vector<8x32xf32>
    %101 = vector.broadcast %68 : vector<1x32xf32> to vector<8x32xf32>
    %102 = arith.addf %98, %101 : vector<8x32xf32>
    %103 = arith.negf %102 : vector<8x32xf32>
    %104 = math.exp %103 : vector<8x32xf32>
    %cst_76 = arith.constant 1.000000e+00 : f32
    %105 = vector.broadcast %cst_76 : f32 to vector<8x32xf32>
    %106 = arith.addf %105, %104 : vector<8x32xf32>
    %107 = arith.divf %105, %106 : vector<8x32xf32>
    %108 = arith.mulf %100, %107 : vector<8x32xf32>
    %109 = arith.addf %108, %60 : vector<8x32xf32>
    %cst_77 = arith.constant 0.707106769 : f32
    %110 = vector.broadcast %cst_77 : f32 to vector<8x32xf32>
    %111 = arith.mulf %109, %110 : vector<8x32xf32>
    %c0_78 = arith.constant 0 : index
    %c0_79 = arith.constant 0 : index
    %112 = vector.load %arg8[%c0_78, %c0_79] : memref<32x32xf32, #tpu.memory_space<vmem>>, vector<32x32xf32>
    %cst_80 = arith.constant dense<0.000000e+00> : vector<8x32xf32>
    %113 = tpu.matmul %111, %112, %cst_80 {dimension_numbers = #tpu.dot_dimension_numbers<[1], [0], [0], [1], [0, 0, 1, 1], [], []>} : vector<8x32xf32>, vector<32x32xf32>, vector<8x32xf32> -> vector<8x32xf32>
    %c0_81 = arith.constant 0 : index
    %c0_82 = arith.constant 0 : index
    %114 = vector.load %arg9[%c0_81, %c0_82] : memref<1x32xf32, #tpu.memory_space<vmem>>, vector<1x32xf32>
    %115 = vector.broadcast %114 : vector<1x32xf32> to vector<8x32xf32>
    %116 = arith.addf %113, %115 : vector<8x32xf32>
    %c0_83 = arith.constant 0 : index
    %c0_84 = arith.constant 0 : index
    %117 = vector.load %arg10[%c0_83, %c0_84] : memref<8x32xf32, #tpu.memory_space<vmem>>, vector<8x32xf32>
    tpu.vector_store %arg10[%c0_83, %c0_84], %116 {strides = array<i32>} : memref<8x32xf32, #tpu.memory_space<vmem>>, vector<8x32xf32>,
    %118 = arith.addf %116, %0 : vector<8x32xf32>
    %cst_85 = arith.constant 0.707106769 : f32
    %119 = vector.broadcast %cst_85 : f32 to vector<8x32xf32>
    %120 = arith.mulf %118, %119 : vector<8x32xf32>
    %c0_86 = arith.constant 0 : index
    %c0_87 = arith.constant 0 : index
    %121 = vector.load %arg11[%c0_86, %c0_87] : memref<8x32xf32, #tpu.memory_space<vmem>>, vector<8x32xf32>
    tpu.vector_store %arg11[%c0_86, %c0_87], %120 {strides = array<i32>} : memref<8x32xf32, #tpu.memory_space<vmem>>, vector<8x32xf32>,
    return
  }
  func.func @transform_0(%arg0: i32) -> (i32, i32) {
    %c0_i32 = arith.constant 0 : i32
    %c0_i32_0 = arith.constant 0 : i32
    return %arg0, %c0_i32 : i32, i32
  }
  func.func @transform_1(%arg0: i32) -> (i32, i32) {
    %c0_i32 = arith.constant 0 : i32
    %c0_i32_0 = arith.constant 0 : i32
    %c0_i32_1 = arith.constant 0 : i32
    return %c0_i32, %c0_i32_0 : i32, i32
  }
  func.func @transform_2(%arg0: i32) -> (i32, i32) {
    %c0_i32 = arith.constant 0 : i32
    %c0_i32_0 = arith.constant 0 : i32
    %c0_i32_1 = arith.constant 0 : i32
    return %c0_i32, %c0_i32_0 : i32, i32
  }
  func.func @transform_3(%arg0: i32) -> (i32, i32, i32, i32) {
    %c0_i32 = arith.constant 0 : i32
    %c0_i32_0 = arith.constant 0 : i32
    %c0_i32_1 = arith.constant 0 : i32
    %c0_i32_2 = arith.constant 0 : i32
    %c0_i32_3 = arith.constant 0 : i32
    return %c0_i32, %c0_i32_0, %c0_i32_1, %c0_i32_2 : i32, i32, i32, i32
  }
  func.func @transform_4(%arg0: i32) -> (i32, i32, i32, i32) {
    %c0_i32 = arith.constant 0 : i32
    %c0_i32_0 = arith.constant 0 : i32
    %c0_i32_1 = arith.constant 0 : i32
    %c0_i32_2 = arith.constant 0 : i32
    %c0_i32_3 = arith.constant 0 : i32
    return %c0_i32, %c0_i32_0, %c0_i32_1, %c0_i32_2 : i32, i32, i32, i32
  }
  func.func @transform_5(%arg0: i32) -> (i32, i32, i32) {
    %c0_i32 = arith.constant 0 : i32
    %c0_i32_0 = arith.constant 0 : i32
    %c0_i32_1 = arith.constant 0 : i32
    %c0_i32_2 = arith.constant 0 : i32
    return %c0_i32, %c0_i32_0, %c0_i32_1 : i32, i32, i32
  }
  func.func @transform_6(%arg0: i32) -> (i32, i32, i32) {
    %c0_i32 = arith.constant 0 : i32
    %c0_i32_0 = arith.constant 0 : i32
    %c0_i32_1 = arith.constant 0 : i32
    %c0_i32_2 = arith.constant 0 : i32
    return %c0_i32, %c0_i32_0, %c0_i32_1 : i32, i32, i32
  }
  func.func @transform_7(%arg0: i32) -> (i32, i32) {
    %c0_i32 = arith.constant 0 : i32
    %c0_i32_0 = arith.constant 0 : i32
    %c0_i32_1 = arith.constant 0 : i32
    return %c0_i32, %c0_i32_0 : i32, i32
  }
  func.func @transform_8(%arg0: i32) -> (i32, i32) {
    %c0_i32 = arith.constant 0 : i32
    %c0_i32_0 = arith.constant 0 : i32
    %c0_i32_1 = arith.constant 0 : i32
    return %c0_i32, %c0_i32_0 : i32, i32
  }
  func.func @transform_9(%arg0: i32) -> (i32, i32) {
    %c0_i32 = arith.constant 0 : i32
    %c0_i32_0 = arith.constant 0 : i32
    return %arg0, %c0_i32 : i32, i32
  }
  func.func @transform_10(%arg0: i32) -> (i32, i32) {
    %c0_i32 = arith.constant 0 : i32
    %c0_i32_0 = arith.constant 0 : i32
    return %arg0, %c0_i32 : i32, i32
  }
}

</mosaic_0001>

<bundles_post_ra>
// kernel: tpu_custom_call.1
= control target key start
LH: loop header
LB: loop body
LE: loop exit
PB: predicated region body
PF: predicated region fallthrough
CT: control target
= control target key end

     0   :  { %s2835_s0 = inlined_call_operand.hbm [shape: f32[16,32], index: 0, kind: input, shape index: {}]   ;;  %s2836_s1 = inlined_call_operand.hbm [shape: f32[32,32], index: 1, kind: input, shape index: {}]   ;;  %s2837_s2 = inlined_call_operand.vmem [shape: f32[1,32], index: 2, kind: input, shape index: {}]   ;;  %s2838_s3 = inlined_call_operand.hbm [shape: f32[2,3,32,32], index: 3, kind: input, shape index: {}]   ;;  %s2839_s4 = inlined_call_operand.hbm [shape: f32[2,3,32,32], index: 4, kind: input, shape index: {}]   ;;  %s2840_s5 = inlined_call_operand.vmem [shape: f32[2,1,32], index: 5, kind: input, shape index: {}]   ;;  %s2841_s6 = inlined_call_operand.vmem [shape: f32[2,1,32], index: 6, kind: input, shape index: {}]   ;;  %s2842_s7 = inlined_call_operand.hbm [shape: f32[32,32], index: 7, kind: input, shape index: {}]   ;;  %s2843_s8 = inlined_call_operand.vmem [shape: f32[1,32], index: 8, kind: input, shape index: {}]   ;;  %s2844_s9 = inlined_call_operand.hbm [shape: f32[16,32], index: 9, kind: output, shape index: {0}]   ;;  %s2845_s10 = inlined_call_operand.hbm [shape: f32[16,32], index: 10, kind: output, shape index: {1}]  }
   0x1   :  { %2851 = sst [smem:[#allocation21_spill]] %s2836_s1 }
   0x2   :  { %2852 = sst [smem:[#allocation22_spill]] %s2838_s3 }
   0x3   :  { %2853 = sst [smem:[#allocation23_spill]] %s2839_s4 }
   0x4   :  { %2854 = sst [smem:[#allocation24_spill]] %s2842_s7 }
   0x5   :  { %16 = vsyncpa [#allocation4], 0 }
   0x6   :  { %18 = vsyncpa [#allocation4 + $0x1], 0 }
   0x7   :  { %19 = vsyncpa [#allocation7], 0 }
   0x8   :  { %20 = vsyncpa [#allocation10], 0 }
   0x9   :  { %21 = vsyncpa [#allocation5], 0 }
   0xa   :  { %23 = vsyncpa [#allocation5 + $0x1], 0 }
   0xb   :  { %24 = vsyncpa [#allocation14], 0 }
   0xc   :  { %26 = vsyncpa [#allocation14 + $0x1], 0  ;;  %s2442_s13 = smov 0   ;;  %s2444_s14 = smov 0  }
   0xd   :  { %s2446_s15 = smov 0   ;;  %s2448_s16 = smov 0  }
   0xe LB: > { %s2376_s17 = smov [#allocation6]   ;;  %s2463_s19 = sadd.s32 4294967295, %s2374_s16   ;;  %s2374_s16 = sphi %s2448_s16, %s2881_s16   ;;  %s2370_s15 = sphi %s2446_s15, %s2880_s15   ;;  %s2366_s14 = sphi %s2444_s14, %s2879_s14   ;;  %s2362_s13 = sphi %s2442_s13, %s2878_s13  }
   0xf   : > { %s295_s18 = sshll.u32 %s2376_s17, 4  ;;  %p1766_p0 = scmp.ge.s32.totalorder %s2374_s16, 1  ;;  %s296_s18 = int_to_ptr.vmem [resolvable:$true] %s295_s18 }
  0x10   : > { %p2846_p1 = scmp.eq.s32.totalorder %s2463_s19, 0  ;;  %p283_p2 = scmp.lt.s32.totalorder %s2374_s16, 3 }
  0x11   : > { %s2377_s21 = smov [#allocation9]   ;;  %s2378_s24 = smov [#allocation8]  }
  0x12   : > { %p2468_p3 = pnand %p1766_p0, %p283_p2  ;;  %s324_s22 = sshll.u32 %s2377_s21, 4  ;;  %s2481_s22 = int_to_ptr.vmem [resolvable:$true] %s324_s22 }
  0x13   : > { %s311_s25 = sshll.u32 %s2378_s24, 4  ;;  %s2151_s26 = scalar_lea.vmem %s296_s18, 512  ;;  %s2483_s25 = int_to_ptr.vmem [resolvable:$true] %s311_s25 }
  0x14   : > { %s2855_s20 = scalar_select %p2468_p3, 1, 0 }
  0x15   : > { %p2058_p5 = pneg %p2468_p3  ;;  %p2152_p8 = scmp.ne.s32.totalorder %s296_s18, %s2151_s26 }
  0x16   : > { %p2159_p11 = scmp.lt.s32.totalorder %s296_s18, %s296_s18  ;;  %p2160_p12 = scmp.lt.s32.totalorder %s2151_s26, %s2151_s26 }
  0x17   : > { %p2477_p6 = pnand %p2058_p5, %p2846_p1 }
  0x18   : > { %p2161_p13 = por %p2160_p12, %p2159_p11 }
  0x19   : > { %p2142_p7 = pneg %p2477_p6 }
  0x1b   : > { %p2154_p9 = pnand %p2152_p8, %p2142_p7 }
  0x1d   : > { %p2155_p10 = pneg %p2154_p9 }
  0x1f   : > { %p2162_p0 = pnand %p2161_p13, %p2155_p10 }
  0x21   : > { %2165 = shalt.err (!%p2162_p0)
}
  0x22   : > { %s2379_s27 = smov 128   ;;  %s2380_s28 = smov 8  }
  0x23   : > { %s2857_s1 = sld [smem:[#allocation21_spill]]  ;;  %s2177_s11 = scalar_lea.vmem %s2481_s22, 3072 }
  0x24   : > { %p2178_p2 = scmp.ne.s32.totalorder %s2481_s22, %s2177_s11  ;;  %p2185_p9 = scmp.lt.s32.totalorder %s2481_s22, %s2481_s22 }
  0x25   : > { %p2186_p10 = scmp.lt.s32.totalorder %s2177_s11, %s2177_s11 }
  0x26   : > { %p2180_p5 = pnand %p2178_p2, %p2142_p7 }
  0x27   : > { %p2187_p11 = por %p2186_p10, %p2185_p9 }
  0x28   : > { %p2181_p8 = pneg %p2180_p5 }
  0x29   : > { %2061 = dma.hbm_to_vmem [thread:$0]  (!%p2477_p6), %s2857_s1, 512, %s296_s18, [#allocation7], %s2379_s27, %s2379_s27, %s2380_s28  }
  0x2a   : > { %p2188_p12 = pnand %p2187_p11, %p2181_p8 }
  0x2c   : > { %2191 = shalt.err (!%p2188_p12)
}
  0x2d   : > { %s2858_s4 = sld [smem:[#allocation23_spill]]  ;;  %s2203_s18 = scalar_lea.vmem %s2483_s25, 3072 }
  0x2e   : > { %p2204_p13 = scmp.ne.s32.totalorder %s2483_s25, %s2203_s18  ;;  %p2211_p5 = scmp.lt.s32.totalorder %s2483_s25, %s2483_s25 }
  0x2f   : > { %p2212_p8 = scmp.lt.s32.totalorder %s2203_s18, %s2203_s18 }
  0x30   : > { %p2206_p0 = pnand %p2204_p13, %p2142_p7 }
  0x31   : > { %p2213_p9 = por %p2212_p8, %p2211_p5 }
  0x32   : > { %p2207_p2 = pneg %p2206_p0 }
  0x33   : > { %2067 = dma.hbm_to_vmem [thread:$0]  (!%p2477_p6), %s2858_s4, 3072, %s2481_s22, [#allocation10], %s2379_s27, %s2379_s27, %s2380_s28  }
  0x34   : > { %p2214_p10 = pnand %p2213_p9, %p2207_p2 }
  0x36   : > { %2217 = shalt.err (!%p2214_p10)
}
  0x37   : > { %s2859_s3 = sld [smem:[#allocation22_spill]]  ;;  %s2381_s24 = smov [#allocation11]  }
  0x38   : > { %s343_s26 = sshll.u32 %s2381_s24, 4  ;;  %s344_s26 = int_to_ptr.vmem [resolvable:$true] %s343_s26 }
  0x39   : > { %s2229_s29 = scalar_lea.vmem %s344_s26, 512  ;;  %p2237_p0 = scmp.lt.s32.totalorder %s344_s26, %s344_s26 }
  0x3a   : > { %p2230_p11 = scmp.ne.s32.totalorder %s344_s26, %s2229_s29  ;;  %p2238_p2 = scmp.lt.s32.totalorder %s2229_s29, %s2229_s29 }
  0x3c   : > { %p2232_p12 = pnand %p2230_p11, %p2142_p7  ;;  %p2239_p5 = por %p2238_p2, %p2237_p0 }
  0x3d   : > { %2064 = dma.hbm_to_vmem [thread:$0]  (!%p2477_p6), %s2859_s3, 3072, %s2483_s25, [#allocation7], %s2379_s27, %s2379_s27, %s2380_s28  }
  0x3e   : > { %p2233_p13 = pneg %p2232_p12 }
  0x40   : > { %p2240_p8 = pnand %p2239_p5, %p2233_p13 }
  0x42   : > { %2243 = shalt.err (!%p2240_p8)
}
  0x43   : > { %s2860_s7 = sld [smem:[#allocation24_spill]]  ;;  %s1765_s23 = sadd.s32 4294967294, %s2374_s16  }
  0x44   : > { %s2543_s11 = sadd.s32 1, %s2374_s16   ;;  %s39_s17 = sadd.s32 1, %s2370_s15 }
  0x45   : > { %s36_s12 = ssub.s32 %s2374_s16, %s2543_s11  ;;  %p46_p9 = scmp.ne.s32.totalorder %s2370_s15, %s2366_s14 }
  0x46   : > { %p37_p7 = scmp.eq.s32.totalorder %s36_s12, 0  ;;  %p47_p10 = scmp.eq.s32.totalorder %s2374_s16, 0 }
  0x47   : > { %p52_p11 = scmp.ne.s32.totalorder %s2366_s14, %s2362_s13  ;;  %p244_p13 = scmp.eq.s32.totalorder %s2463_s19, 1 }
  0x48   : > { %s2554_s18 = scalar_select %p37_p7, %s2370_s15, %s39_s17  }
  0x49   : > { %2070 = dma.hbm_to_vmem [thread:$0]  (!%p2477_p6), %s2860_s7, 512, %s344_s26, [#allocation10], %s2379_s27, %s2379_s27, %s2380_s28  }
  0x4a   : > { %2861 = sst [smem:[#allocation20_spill]] %s2554_s18  ;;  %p2556_p12 = por %p47_p10, %p46_p9 }
  0x4b   : > { %p2562_p6 = por %p2846_p1, %p52_p11  ;;  %p250_p0 = scmp.eq.s32.totalorder %s1765_s23, 1 }
  0x4c   : > { %p2086_p2 = scmp.lt.s32.totalorder %s2374_s16, 2  ;;  %s360_s28 = sand.u32 1, %s2370_s15  }
  0x4d   : > { %s2863_s27 = scalar_select %p2562_p6, 1, 0 }
  0x4e   : > { %p2569_p5 = por %p244_p13, %p46_p9  ;;  %p2573_p8 = por %p250_p0, %p52_p11 }
  0x4f   : > { %s1772_s26 = sshll.u32 %s360_s28, 3  ;;  %s1773_s29 = sshll.u32 %s2374_s16, 7 }
  0x50   : > { %s2864_s22 = scalar_select %p2569_p5, 1, 0 }
  0x51   : > { %s2865_s24 = scalar_select %p2573_p8, 1, 0 }
  0x52   : > { %s2581_s12 = scalar_lea.hbm %s2835_s0, %s1773_s29  ;;  %s364_s23 = scalar_lea.vmem [#allocation3], %s1772_s26 }
  0x53   : > { %s371_s17 = sshll.u32 %s364_s23, 4  ;;  %p2585_p7 = pnand %p2086_p2, %p2556_p12  ;;  %s372_s17 = int_to_ptr.vmem [resolvable:$true] %s371_s17 }
  0x54   : > { %s361_s3 = scalar_lea.sflag [#allocation4], %s360_s28  ;;  %s2244_s4 = scalar_lea.hbm %s2581_s12, 128 }
  0x55   : > { %p2245_p9 = scmp.ne.s32.totalorder %s2581_s12, %s2244_s4  ;;  %p2246_p10 = pneg %p2585_p7 }
  0x56   : > { %s2249_s30 = scalar_lea.hbm %s2835_s0, 256  ;;  %p2250_p0 = scmp.lt.s32.totalorder %s2581_s12, %s2835_s0 }
  0x57   : > { %p2247_p11 = pnand %p2246_p10, %p2245_p9  ;;  %p2251_p12 = scmp.lt.s32.totalorder %s2249_s30, %s2244_s4 }
  0x59   : > { %p2248_p13 = pneg %p2247_p11  ;;  %p2252_p2 = por %p2251_p12, %p2250_p0 }
  0x5b   : > { %p2253_p4 = pnand %p2252_p2, %p2248_p13 }
  0x5d   : > { %2256 = shalt.err (!%p2253_p4)
}
  0x5e   : > { %s2257_s21 = scalar_lea.vmem %s372_s17, 128  ;;  %s2382_s28 = smov [#allocation3]  }
  0x5f   : > { %p2258_p1 = scmp.ne.s32.totalorder %s372_s17, %s2257_s21  ;;  %s2262_s7 = sshll.u32 %s2382_s28, 4  ;;  %s2263_s7 = int_to_ptr.vmem [resolvable:$false] %s2262_s7 }
  0x60   : > { %s2264_s18 = scalar_lea.vmem %s2263_s7, 256  ;;  %p2265_p9 = scmp.lt.s32.totalorder %s372_s17, %s2263_s7 }
  0x61   : > { %p2260_p8 = pnand %p2258_p1, %p2246_p10  ;;  %p2266_p11 = scmp.lt.s32.totalorder %s2264_s18, %s2257_s21 }
  0x63   : > { %p2261_p5 = pneg %p2260_p8  ;;  %p2267_p6 = por %p2266_p11, %p2265_p9 }
  0x65   : > { %p2268_p3 = pnand %p2267_p6, %p2261_p5 }
  0x67   : > { %2271 = shalt.err (!%p2268_p3)
}
  0x68   : > { %2074 = dma.hbm_to_vmem [thread:$0]  (!%p2585_p7), %s2581_s12, 128, %s372_s17, %s361_s3  }
  0x69   : > { %p2867_p13 = scmp.ne.s32.totalorder %s2855_s20, 0 }
  0x6a   : > { %s2606_s4 = sand.u32 (!%p2867_p13), 1, %s2366_s14   ;;  %p2868_p1 = scmp.ne.s32.totalorder (!%p2867_p13), %s2863_s27, 0 }
  0x6b   : > { %380 = sbr.rel (%p2867_p13) target bundleno = 1079 (0x437), region = 56  ;;  %s2609_s29 = sshll.u32 (!%p2867_p13), %s2606_s4, 3 }
  0x6c   : > { %s383_s7 = scalar_lea.sflag (!%p2867_p13), [#allocation4], %s2606_s4  ;;  %s386_s18 = scalar_lea.vmem (!%p2867_p13), [#allocation3], %s2609_s29 }
  0x70   : > { %2341 = dma.done.wait (%p2868_p1), %s383_s7, 128  }
  0x71   : > { %2343 = vsyncadd (%p2868_p1), %s383_s7, 4294967168  ;;  %p2869_p3 = scmp.eq.s32.totalorder %s2463_s19, 0 }
  0x73   : > { %2345 = dma.done.wait (%p2869_p3), [#allocation7], 3584   ;;  %p2870_p4 = pmov %p2869_p3 }
  0x74   : > { %p2871_p6 = pmov %p2869_p3 }
  0x75   : > { %2347 = vsyncadd (%p2870_p4), [#allocation7], 4294963712 }
  0x76   : > { %2349 = dma.done.wait (%p2871_p6), [#allocation10], 3584   ;;  %p2872_p5 = pmov %p2869_p3 }
  0x77   : > { %v2383_v0 = vmov 0.0   ;;  %vm2384_vm0 = vmmov 0   ;;  %v448_v1 = vld [vmem:[#allocation6 + $0x18] sm:$0xff]  ;;  %v447_v2 = vld [vmem:[#allocation6 + $0x10] sm:$0xff]  ;;  %v446_v3 = vld [vmem:[#allocation6 + $0x8] sm:$0xff]  ;;  %vm456_vm1 = vcmask 261120  }
  0x78   : > { %2351 = vsyncadd (%p2872_p5), [#allocation10], 4294963712  ;;  %1882 = vmatprep.subr.mxu0 %v2383_v0  ;;  %1890 = vmatprep.mubr.msk.f32.mxu0 %vm2384_vm0, %v2383_v0  ;;  %v445_v4 = vld [vmem:[#allocation6] sm:$0xff]  ;;  %v2633_v5 = vld [vmem:[%s386_s18] sm:$0xff]  ;;  %vm530_vm2 = vcmask 253952   ;;  %s1808_s7 = sshll.u32 %s2463_s19, 7 }
  0x79   : > { %1893 = vmatprep.subr.mxu1 %v2383_v0  ;;  %1901 = vmatprep.mubr.msk.f32.mxu1 %vm2384_vm0, %v2383_v0  ;;  %v540_v6 = vld [vmem:[#allocation8 + $0x38] sm:$0xff]  ;;  %v539_v8 = vld [vmem:[#allocation8 + $0x30] sm:$0xff]  ;;  %v538_v10 = vld [vmem:[#allocation8 + $0x28] sm:$0xff]  ;;  %531 = vst.msk [vmem:[#allocation2] sm:$0x1] %vm530_vm2, %v2383_v0  ;;  %s436_s18 = scalar_lea.vmem [#allocation12], %s2609_s29  ;;  %s2763_s27 = scalar_lea.hbm %s2844_s9, %s1808_s7 }
  0x7a   : > { %1883 = vmatpush3.msra.mxu0 %v448_v1  ;;  %v552_v7 = vld [vmem:[#allocation9 + $0x38] sm:$0xff]  ;;  %1894 = vmatpush3.msra.mxu1 %v540_v6  ;;  %v551_v9 = vld [vmem:[#allocation9 + $0x30] sm:$0xff]  ;;  %v550_v11 = vld [vmem:[#allocation9 + $0x28] sm:$0xff]  ;;  %532 = vst.msk [vmem:[#allocation2 + $0x9] sm:$0x1] %vm530_vm2, %v2383_v0  ;;  %s1612_s1 = sshll.u32 %s436_s18, 4  ;;  %s2765_s1 = int_to_ptr.vmem [resolvable:$true] %s1612_s1 }
  0x7b   : > { %1884 = vmatprep.subr.mxu0 %v2383_v0  ;;  %1895 = vmatprep.subr.mxu1 %v2383_v0  ;;  %v537_v12 = vld [vmem:[#allocation8 + $0x20] sm:$0xff]  ;;  %v536_v18 = vld [vmem:[#allocation8 + $0x18] sm:$0xff]  ;;  %v535_v21 = vld [vmem:[#allocation8 + $0x10] sm:$0xff]  ;;  %s2850_s12 = scalar_lea.vmem [#allocation13], %s2609_s29  ;;  %s1594_s25 = scalar_lea.sflag [#allocation5], %s2606_s4 }
  0x7c   : > { %1885 = vmatpush3.msra.mxu0 %v447_v2  ;;  %1896 = vmatpush3.msra.mxu1 %v539_v8  ;;  %v549_v13 = vld [vmem:[#allocation9 + $0x20] sm:$0xff]  ;;  %v548_v19 = vld [vmem:[#allocation9 + $0x18] sm:$0xff]  ;;  %v547_v22 = vld [vmem:[#allocation9 + $0x10] sm:$0xff]  ;;  %s2770_s17 = sshll.u32 %s2850_s12, 4  ;;  %s2272_s30 = scalar_lea.vmem %s2765_s1, 128  ;;  %s1626_s17 = int_to_ptr.vmem [resolvable:$true] %s2770_s17 }
  0x7d   : > { %1886 = vmatprep.subr.mxu0 %v2383_v0  ;;  %1897 = vmatprep.subr.mxu1 %v2383_v0  ;;  %v1782_v14 = vld [vmem:[%s2837_s2] ss:$0 sm:$0xff]  ;;  %v534_v23 = vld [vmem:[#allocation8 + $0x8] sm:$0xff]  ;;  %v544_v28 = vld [vmem:[#allocation8 + $0x58] sm:$0xff]  ;;  %p2273_p8 = scmp.ne.s32.totalorder %s2765_s1, %s2272_s30  ;;  %p2873_p7 = scmp.ne.s32.totalorder %s2864_s22, 0 }
  0x7e   : > { %1887 = vmatpush3.msra.mxu0 %v446_v3  ;;  %1898 = vmatpush3.msra.mxu1 %v538_v10  ;;  %v546_v24 = vld [vmem:[#allocation9 + $0x8] sm:$0xff]  ;;  %v533_v25 = vld [vmem:[#allocation8] sm:$0xff]  ;;  %v556_v29 = vld [vmem:[#allocation9 + $0x58] sm:$0xff]  ;;  %s2385_s26 = smov [#allocation12]  }
  0x7f   : > { %1888 = vmatprep.subr.mxu0 %v2383_v0  ;;  %1899 = vmatprep.subr.mxu1 %v2383_v0  ;;  %v545_v26 = vld [vmem:[#allocation9] sm:$0xff]  ;;  %v543_v30 = vld [vmem:[#allocation8 + $0x50] sm:$0xff]  ;;  %v542_v32 = vld [vmem:[#allocation8 + $0x48] sm:$0xff]  ;;  %p2274_p10 = pnand %p2273_p8, %p2873_p7  ;;  %s2276_s23 = sshll.u32 %s2385_s26, 4  ;;  %s2277_s23 = int_to_ptr.vmem [resolvable:$false] %s2276_s23 }
  0x80   : > { %1889 = vmatpush3.msra.mxu0 %v445_v4  ;;  %1900 = vmatpush3.msra.mxu1 %v537_v12  ;;  %v555_v31 = vld [vmem:[#allocation9 + $0x50] sm:$0xff]  ;;  %v554_v33 = vld [vmem:[#allocation9 + $0x48] sm:$0xff]  ;;  %v541_v34 = vld [vmem:[#allocation8 + $0x40] sm:$0xff]  ;;  %s2278_s21 = scalar_lea.vmem %s2277_s23, 256  ;;  %p2279_p12 = scmp.lt.s32.totalorder %s2765_s1, %s2277_s23 }
  0x81   : > { %1891 = vmatmul.mubr.msk.f32.vlgmr.msra.gmra.mxu0 %vm456_vm1, %v2633_v5  ;;  %1904 = vmatprep.subr.mxu0 %v2383_v0  ;;  %v553_v35 = vld [vmem:[#allocation9 + $0x40] sm:$0xff]  ;;  %v1025_v37 = vld [vmem:[#allocation8 + $0x98] sm:$0xff]  ;;  %v1024_v39 = vld [vmem:[#allocation8 + $0x90] sm:$0xff]  ;;  %p2275_p0 = pneg %p2274_p10  ;;  %p2280_p2 = scmp.lt.s32.totalorder %s2278_s21, %s2272_s30 }
  0x82   : > { %1912 = vmatprep.mubr.msk.f32.mxu0 %vm2384_vm0, %v2383_v0  ;;  %1905 = vmatpush3.msra.mxu0 %v552_v7  ;;  %v1038_v38 = vld [vmem:[#allocation9 + $0x98] sm:$0xff]  ;;  %v1037_v40 = vld [vmem:[#allocation9 + $0x90] sm:$0xff]  ;;  %v1023_v41 = vld [vmem:[#allocation8 + $0x88] sm:$0xff] }
  0x83   : > { %1906 = vmatprep.subr.mxu0 %v2383_v0  ;;  %1915 = vmatprep.subr.mxu1 %v2383_v0  ;;  %v1036_v42 = vld [vmem:[#allocation9 + $0x88] sm:$0xff]  ;;  %v1022_v43 = vld [vmem:[#allocation8 + $0x80] sm:$0xff]  ;;  %v1021_v10 = vld [vmem:[#allocation8 + $0x78] sm:$0xff]  ;;  %p2281_p9 = por %p2280_p2, %p2279_p12 }
  0x84   : > { %1907 = vmatpush3.msra.mxu0 %v551_v9  ;;  %v1035_v44 = vld [vmem:[#allocation9 + $0x80] sm:$0xff] }
  0x85   : > { %1908 = vmatprep.subr.mxu0 %v2383_v0  ;;  %v1791_v55 = vld [vmem:[%s2841_s6] ss:$0 sm:$0xff]  ;;  %p2282_p11 = pnand %p2281_p9, %p2275_p0 }
  0x86   : > { %1909 = vmatpush3.msra.mxu0 %v550_v11  ;;  %v1790_v3 = vld [vmem:[%s2840_s5] ss:$0 sm:$0xff]  ;;  %v1034_v11 = vld [vmem:[#allocation9 + $0x78] sm:$0xff] }
  0x87   : > { %1910 = vmatprep.subr.mxu0 %v2383_v0 }
  0x88   : > { %1911 = vmatpush3.msra.mxu0 %v549_v13  ;;  %v1020_v13 = vld [vmem:[#allocation8 + $0x70] sm:$0xff] }
  0x89   : > { %1926 = vmatprep.subr.mxu0 %v2383_v0 }
 0x141   : > { %v526_v15 = vpop.f32.mrf.mxu0 }
 0x142   : > { %v2654_v16 = vadd.f32 %v1782_v14, %v526_v15  ;;  %v1033_v14 = vld [vmem:[#allocation9 + $0x70] sm:$0xff]  ;;  %v1019_v15 = vld [vmem:[#allocation8 + $0x68] sm:$0xff] }
 0x143   : > { %v1892_v17 = vpop.f32.mrf.mxu0 }
 0x144   : > { %559 = vst.msk [vmem:[#allocation2 + $0x1] sm:$0xff] %vm456_vm1, %v2654_v16  ;;  %v1018_v17 = vld [vmem:[#allocation8 + $0x60] sm:$0xff] }
 0x14b   : > { %v561_v20 = vld [vmem:[#allocation2 + $0x1] sm:$0xff] }
 0x14c   : > { %1902 = vmatmul.mubr.msk.f32.vlgmr.msra.gmra.mxu1 %vm456_vm1, %v561_v20  ;;  %1913 = vmatmul.mubr.msk.f32.vlgmr.msra.gmra.mxu0 %vm456_vm1, %v561_v20  ;;  %v560_v27 = vld [vmem:[#allocation2] sm:$0xff]  ;;  %v1029_v20 = vld [vmem:[#allocation8 + $0xb8] sm:$0xff] }
 0x14d   : > { %1916 = vmatpush3.msra.mxu1 %v536_v18  ;;  %1927 = vmatpush3.msra.mxu0 %v548_v19  ;;  %v848_v36 = vld [vmem:[#allocation2 + $0x2] sm:$0xff] }
 0x14e   : > { %1917 = vmatprep.subr.mxu1 %v2383_v0  ;;  %1928 = vmatprep.subr.mxu0 %v2383_v0  ;;  %v1031_v18 = vld [vmem:[#allocation9 + $0x60] sm:$0xff] }
 0x14f   : > { %1918 = vmatpush3.msra.mxu1 %v535_v21  ;;  %1929 = vmatpush3.msra.mxu0 %v547_v22  ;;  %v1042_v21 = vld [vmem:[#allocation9 + $0xb8] sm:$0xff]  ;;  %v1028_v22 = vld [vmem:[#allocation8 + $0xb0] sm:$0xff] }
 0x150   : > { %1919 = vmatprep.subr.mxu1 %v2383_v0  ;;  %1930 = vmatprep.subr.mxu0 %v2383_v0 }
 0x151   : > { %1920 = vmatpush3.msra.mxu1 %v534_v23  ;;  %1931 = vmatpush3.msra.mxu0 %v546_v24  ;;  %v1041_v23 = vld [vmem:[#allocation9 + $0xb0] sm:$0xff]  ;;  %v1027_v24 = vld [vmem:[#allocation8 + $0xa8] sm:$0xff] }
 0x152   : > { %1921 = vmatprep.subr.mxu1 %v2383_v0  ;;  %1932 = vmatprep.subr.mxu0 %v2383_v0 }
 0x153   : > { %1922 = vmatpush3.msra.mxu1 %v533_v25  ;;  %1923 = vmatprep.mubr.msk.f32.mxu1 %vm2384_vm0, %v2383_v0  ;;  %v1040_v25 = vld [vmem:[#allocation9 + $0xa8] sm:$0xff] }
 0x154   : > { %1933 = vmatpush3.msra.mxu0 %v545_v26  ;;  %1934 = vmatprep.mubr.msk.f32.mxu0 %vm2384_vm0, %v2383_v0  ;;  %v1026_v26 = vld [vmem:[#allocation8 + $0xa0] sm:$0xff] }
 0x155   : > { %1924 = vmatmul.mubr.msk.f32.vlgmr.msra.gmra.mxu1 %vm456_vm1, %v560_v27  ;;  %1935 = vmatmul.mubr.msk.f32.vlgmr.msra.gmra.mxu0 %vm456_vm1, %v560_v27  ;;  %v1039_v27 = vld [vmem:[#allocation9 + $0xa0] sm:$0xff] }
 0x156   : > { %1937 = vmatprep.subr.mxu1 %v2383_v0  ;;  %1948 = vmatprep.subr.mxu0 %v2383_v0 }
 0x157   : > { %1938 = vmatpush3.msra.mxu1 %v544_v28  ;;  %1949 = vmatpush3.msra.mxu0 %v556_v29  ;;  %v1508_v29 = vld [vmem:[#allocation11 + $0x18] sm:$0xff] }
 0x158   : > { %1939 = vmatprep.subr.mxu1 %v2383_v0  ;;  %1950 = vmatprep.subr.mxu0 %v2383_v0 }
 0x159   : > { %1940 = vmatpush3.msra.mxu1 %v543_v30  ;;  %1951 = vmatpush3.msra.mxu0 %v555_v31  ;;  %v1507_v30 = vld [vmem:[#allocation11 + $0x10] sm:$0xff]  ;;  %v1506_v31 = vld [vmem:[#allocation11 + $0x8] sm:$0xff] }
 0x15a   : > { %1941 = vmatprep.subr.mxu1 %v2383_v0  ;;  %1952 = vmatprep.subr.mxu0 %v2383_v0 }
 0x15b   : > { %1942 = vmatpush3.msra.mxu1 %v542_v32  ;;  %1953 = vmatpush3.msra.mxu0 %v554_v33  ;;  %v1505_v32 = vld [vmem:[#allocation11] sm:$0xff] }
 0x15c   : > { %1943 = vmatprep.subr.mxu1 %v2383_v0  ;;  %1954 = vmatprep.subr.mxu0 %v2383_v0 }
 0x15d   : > { %1944 = vmatpush3.msra.mxu1 %v541_v34  ;;  %1945 = vmatprep.mubr.msk.f32.mxu1 %vm2384_vm0, %v2383_v0 }
 0x15e   : > { %1955 = vmatpush3.msra.mxu0 %v553_v35  ;;  %1956 = vmatprep.mubr.msk.f32.mxu0 %vm2384_vm0, %v2383_v0 }
 0x15f   : > { %1946 = vmatmul.mubr.msk.f32.vlgmr.msra.gmra.mxu1 %vm456_vm1, %v848_v36  ;;  %1957 = vmatmul.mubr.msk.f32.vlgmr.msra.gmra.mxu0 %vm456_vm1, %v848_v36 }
 0x160   : > { %1959 = vmatprep.subr.mxu1 %v2383_v0  ;;  %1970 = vmatprep.subr.mxu0 %v2383_v0 }
 0x161   : > { %1967 = vmatprep.mubr.msk.f32.mxu1 %vm2384_vm0, %v2383_v0  ;;  %1978 = vmatprep.mubr.msk.f32.mxu0 %vm2384_vm0, %v2383_v0 }
 0x162   : > { %1960 = vmatpush3.msra.mxu1 %v1025_v37  ;;  %1971 = vmatpush3.msra.mxu0 %v1038_v38 }
 0x163   : > { %1961 = vmatprep.subr.mxu1 %v2383_v0  ;;  %1972 = vmatprep.subr.mxu0 %v2383_v0 }
 0x164   : > { %1962 = vmatpush3.msra.mxu1 %v1024_v39  ;;  %1973 = vmatpush3.msra.mxu0 %v1037_v40 }
 0x165   : > { %1963 = vmatprep.subr.mxu1 %v2383_v0  ;;  %1974 = vmatprep.subr.mxu0 %v2383_v0 }
 0x166   : > { %1964 = vmatpush3.msra.mxu1 %v1023_v41  ;;  %1975 = vmatpush3.msra.mxu0 %v1036_v42 }
 0x167   : > { %1965 = vmatprep.subr.mxu1 %v2383_v0  ;;  %1976 = vmatprep.subr.mxu0 %v2383_v0 }
 0x168   : > { %1966 = vmatpush3.msra.mxu1 %v1022_v43  ;;  %1977 = vmatpush3.msra.mxu0 %v1035_v44  ;;  %v1802_v43 = vld [vmem:[%s2841_s6 + $0x1] ss:$0 sm:$0xff] }
 0x169   : > { %1981 = vmatprep.subr.mxu1 %v2383_v0  ;;  %1992 = vmatprep.subr.mxu0 %v2383_v0 }
 0x20c   : > { %v631_v45 = vpop.f32.mrf.mxu1  ;;  %v701_v46 = vpop.f32.mrf.mxu0 }
 0x20e   : > { %v1903_v47 = vpop.f32.mrf.mxu1  ;;  %v1914_v48 = vpop.f32.mrf.mxu0 }
 0x215   : > { %v774_v49 = vpop.f32.mrf.mxu1  ;;  %v844_v50 = vpop.f32.mrf.mxu0 }
 0x216   : > { %v845_v53 = vadd.f32 %v844_v50, %v701_v46  ;;  %v775_v1 = vadd.f32 %v774_v49, %v631_v45 }
 0x217   : > { %v1925_v51 = vpop.f32.mrf.mxu1  ;;  %v1936_v52 = vpop.f32.mrf.mxu0 }
 0x21f   : > { %v918_v54 = vpop.f32.mrf.mxu1  ;;  %v988_v56 = vpop.f32.mrf.mxu0 }
 0x220   : > { %v993_v57 = vadd.f32 %v988_v56, %v845_v53  ;;  %v992_v2 = vadd.f32 %v918_v54, %v775_v1  ;;  %v1801_v53 = vld [vmem:[%s2840_s5 + $0x1] ss:$0 sm:$0xff] }
 0x221   : > { %v1947_v58 = vpop.f32.mrf.mxu1  ;;  %v1958_v59 = vpop.f32.mrf.mxu0 }
 0x222   : > { %v1007_v60 = vadd.f32 %v1791_v55, %v993_v57  ;;  %v1000_v4 = vadd.f32 %v1790_v3, %v992_v2  ;;  %v1804_v59 = vld [vmem:[%s2843_s8] ss:$0 sm:$0xff] }
 0x224   : > { %v1792_v61 = vmul.f32 -1.442695, %v1007_v60 }
 0x226   : > { %2132 = vpow2.f32 %v1792_v61 }
 0x233   : > { %v2133_v62 = vpop.eup %2132 }
 0x234   : > { %v1011_v63 = vadd.f32 1.0, %v2133_v62 }
 0x236   : > { %2134 = vrcp.f32 %v1011_v63 }
 0x243   : > { %v2135_v6 = vpop.eup %2134 }
 0x244   : > { %v1014_v7 = vmul.f32 %v2135_v6, %v1000_v4 }
 0x246   : > { %v1015_v8 = vadd.f32 %v1014_v7, %v2654_v16  ;;  %v1032_v16 = vld [vmem:[#allocation9 + $0x68] sm:$0xff] }
 0x248   : > { %v2707_v9 = vmul.f32 0.70710677, %v1015_v8 }
 0x24a   : > { %1047 = vst.msk [vmem:[#allocation2 + $0x1] sm:$0xff] %vm456_vm1, %v2707_v9 }
 0x251   : > { %v1049_v12 = vld [vmem:[#allocation2 + $0x1] sm:$0xff] }
 0x252   : > { %1968 = vmatmul.mubr.msk.f32.vlgmr.msra.gmra.mxu1 %vm456_vm1, %v1049_v12  ;;  %1979 = vmatmul.mubr.msk.f32.vlgmr.msra.gmra.mxu0 %vm456_vm1, %v1049_v12  ;;  %v1048_v19 = vld [vmem:[#allocation2] sm:$0xff] }
 0x253   : > { %1982 = vmatpush3.msra.mxu1 %v1021_v10  ;;  %1993 = vmatpush3.msra.mxu0 %v1034_v11  ;;  %v1336_v28 = vld [vmem:[#allocation2 + $0x2] sm:$0xff] }
 0x254   : > { %1983 = vmatprep.subr.mxu1 %v2383_v0  ;;  %1994 = vmatprep.subr.mxu0 %v2383_v0 }
 0x255   : > { %1984 = vmatpush3.msra.mxu1 %v1020_v13  ;;  %1995 = vmatpush3.msra.mxu0 %v1033_v14 }
 0x256   : > { %1985 = vmatprep.subr.mxu1 %v2383_v0  ;;  %1996 = vmatprep.subr.mxu0 %v2383_v0 }
 0x257   : > { %1986 = vmatpush3.msra.mxu1 %v1019_v15  ;;  %1997 = vmatpush3.msra.mxu0 %v1032_v16 }
 0x258   : > { %1987 = vmatprep.subr.mxu1 %v2383_v0  ;;  %1998 = vmatprep.subr.mxu0 %v2383_v0 }
 0x259   : > { %1988 = vmatpush3.msra.mxu1 %v1018_v17  ;;  %1989 = vmatprep.mubr.msk.f32.mxu1 %vm2384_vm0, %v2383_v0 }
 0x25a   : > { %1999 = vmatpush3.msra.mxu0 %v1031_v18  ;;  %2000 = vmatprep.mubr.msk.f32.mxu0 %vm2384_vm0, %v2383_v0 }
 0x25b   : > { %1990 = vmatmul.mubr.msk.f32.vlgmr.msra.gmra.mxu1 %vm456_vm1, %v1048_v19  ;;  %2001 = vmatmul.mubr.msk.f32.vlgmr.msra.gmra.mxu0 %vm456_vm1, %v1048_v19 }
 0x25c   : > { %2003 = vmatprep.subr.mxu1 %v2383_v0  ;;  %2014 = vmatprep.subr.mxu0 %v2383_v0 }
 0x25d   : > { %2004 = vmatpush3.msra.mxu1 %v1029_v20  ;;  %2015 = vmatpush3.msra.mxu0 %v1042_v21 }
 0x25e   : > { %2005 = vmatprep.subr.mxu1 %v2383_v0  ;;  %2016 = vmatprep.subr.mxu0 %v2383_v0 }
 0x25f   : > { %2006 = vmatpush3.msra.mxu1 %v1028_v22  ;;  %2017 = vmatpush3.msra.mxu0 %v1041_v23 }
 0x260   : > { %2007 = vmatprep.subr.mxu1 %v2383_v0  ;;  %2018 = vmatprep.subr.mxu0 %v2383_v0 }
 0x261   : > { %2008 = vmatpush3.msra.mxu1 %v1027_v24  ;;  %2019 = vmatpush3.msra.mxu0 %v1040_v25 }
 0x262   : > { %2009 = vmatprep.subr.mxu1 %v2383_v0  ;;  %2020 = vmatprep.subr.mxu0 %v2383_v0 }
 0x263   : > { %2010 = vmatpush3.msra.mxu1 %v1026_v26  ;;  %2011 = vmatprep.mubr.msk.f32.mxu1 %vm2384_vm0, %v2383_v0 }
 0x264   : > { %2021 = vmatpush3.msra.mxu0 %v1039_v27  ;;  %2022 = vmatprep.mubr.msk.f32.mxu0 %vm2384_vm0, %v2383_v0 }
 0x265   : > { %2012 = vmatmul.mubr.msk.f32.vlgmr.msra.gmra.mxu1 %vm456_vm1, %v1336_v28  ;;  %2023 = vmatmul.mubr.msk.f32.vlgmr.msra.gmra.mxu0 %vm456_vm1, %v1336_v28 }
 0x266   : > { %2025 = vmatprep.subr.mxu1 %v2383_v0  ;;  %2033 = vmatprep.mubr.msk.f32.mxu1 %vm2384_vm0, %v2383_v0 }
 0x267   : > { %2026 = vmatpush3.msra.mxu1 %v1508_v29 }
 0x268   : > { %2027 = vmatprep.subr.mxu1 %v2383_v0 }
 0x269   : > { %2028 = vmatpush3.msra.mxu1 %v1507_v30 }
 0x26a   : > { %2029 = vmatprep.subr.mxu1 %v2383_v0 }
 0x26b   : > { %2030 = vmatpush3.msra.mxu1 %v1506_v31 }
 0x26c   : > { %2031 = vmatprep.subr.mxu1 %v2383_v0 }
 0x26d   : > { %2032 = vmatpush3.msra.mxu1 %v1505_v32 }
 0x312   : > { %v1119_v33 = vpop.f32.mrf.mxu1  ;;  %v1189_v34 = vpop.f32.mrf.mxu0 }
 0x314   : > { %v1969_v35 = vpop.f32.mrf.mxu1  ;;  %v1980_v36 = vpop.f32.mrf.mxu0 }
 0x31b   : > { %v1262_v37 = vpop.f32.mrf.mxu1  ;;  %v1332_v38 = vpop.f32.mrf.mxu0 }
 0x31c   : > { %v1333_v41 = vadd.f32 %v1332_v38, %v1189_v34  ;;  %v1263_v51 = vadd.f32 %v1262_v37, %v1119_v33 }
 0x31d   : > { %v1991_v39 = vpop.f32.mrf.mxu1  ;;  %v2002_v40 = vpop.f32.mrf.mxu0 }
 0x325   : > { %v1406_v42 = vpop.f32.mrf.mxu1  ;;  %v1476_v44 = vpop.f32.mrf.mxu0 }
 0x326   : > { %v1481_v45 = vadd.f32 %v1476_v44, %v1333_v41  ;;  %v1480_v52 = vadd.f32 %v1406_v42, %v1263_v51 }
 0x327   : > { %v2013_v46 = vpop.f32.mrf.mxu1  ;;  %v2024_v47 = vpop.f32.mrf.mxu0 }
 0x328   : > { %v1495_v0 = vadd.f32 %v1802_v43, %v1481_v45  ;;  %v1488_v54 = vadd.f32 %v1801_v53, %v1480_v52 }
 0x32a   : > { %v1803_v48 = vmul.f32 -1.442695, %v1495_v0 }
 0x32c   : > { %2136 = vpow2.f32 %v1803_v48 }
 0x339   : > { %v2137_v49 = vpop.eup %2136 }
 0x33a   : > { %v1499_v50 = vadd.f32 1.0, %v2137_v49 }
 0x33c   : > { %2138 = vrcp.f32 %v1499_v50 }
 0x349   : > { %v2139_v55 = vpop.eup %2138 }
 0x34a   : > { %v1502_v56 = vmul.f32 %v2139_v55, %v1488_v54 }
 0x34c   : > { %v1503_v57 = vadd.f32 %v1502_v56, %v2707_v9 }
 0x34e   : > { %v1504_v58 = vmul.f32 0.70710677, %v1503_v57 }
 0x350   : > { %2034 = vmatmul.mubr.msk.f32.vlgmr.msra.gmra.mxu1 %vm456_vm1, %v1504_v58 }
 0x410   : > { %v1585_v60 = vpop.f32.mrf.mxu1 }
 0x411   : > { %v1586_v61 = vadd.f32 %v1804_v59, %v1585_v60 }
 0x412   : > { %v2035_v62 = vpop.f32.mrf.mxu1 }
 0x413   : > { %v1590_v63 = vadd.f32 %v1586_v61, %v2633_v5  ;;  %1589 = vst.msk [vmem:[%s436_s18] sm:$0xff] %vm456_vm1, %v1586_v61 }
 0x414   : > { %2285 = shalt.err (!%p2282_p11)
}
 0x415   : > { %s2286_s28 = scalar_lea.hbm %s2763_s27, 128  ;;  %s2290_s20 = scalar_lea.hbm %s2844_s9, 256 }
 0x416   : > { %p2287_p13 = scmp.ne.s32.totalorder %s2763_s27, %s2286_s28  ;;  %p2291_p4 = scmp.lt.s32.totalorder %s2763_s27, %s2844_s9 }
 0x417   : > { %p2292_p6 = scmp.lt.s32.totalorder %s2290_s20, %s2286_s28 }
 0x418   : > { %p2288_p1 = pnand %p2287_p13, %p2873_p7 }
 0x419   : > { %p2293_p5 = por %p2292_p6, %p2291_p4 }
 0x41a   : > { %p2289_p3 = pneg %p2288_p1 }
 0x41c   : > { %p2294_p8 = pnand %p2293_p5, %p2289_p3 }
 0x41e   : > { %2297 = shalt.err (!%p2294_p8)
}
 0x41f   : > { %2054 = dma.vmem_to_hbm [thread:$0]  (%p2873_p7), %s2765_s1, 128, %s2763_s27, %s1594_s25   ;;  %v1591_v5 = vmul.f32 0.70710677, %v1590_v63 }
 0x420   : > { %s1623_s12 = scalar_lea.hbm %s2845_s10, %s1808_s7  ;;  %s2874_s21 = scalar_lea.vmem [#allocation13], %s2609_s29 }
 0x421   : > { %1592 = vst.msk [vmem:[%s2874_s21] sm:$0xff] %vm456_vm1, %v1591_v5  ;;  %s1599_s28 = scalar_lea.sflag [#allocation14], %s2606_s4  ;;  %s2298_s18 = scalar_lea.vmem %s1626_s17, 128 }
 0x422   : > { %p2299_p10 = scmp.ne.s32.totalorder %s1626_s17, %s2298_s18  ;;  %s2386_s3 = smov [#allocation13]  }
 0x423   : > { %s2302_s20 = sshll.u32 %s2386_s3, 4  ;;  %s2303_s20 = int_to_ptr.vmem [resolvable:$false] %s2302_s20 }
 0x424   : > { %p2300_p0 = pnand %p2299_p10, %p2873_p7  ;;  %s2304_s1 = scalar_lea.vmem %s2303_s20, 256 }
 0x425   : > { %p2305_p2 = scmp.lt.s32.totalorder %s1626_s17, %s2303_s20  ;;  %p2306_p9 = scmp.lt.s32.totalorder %s2304_s1, %s2298_s18 }
 0x426   : > { %p2301_p12 = pneg %p2300_p0 }
 0x427   : > { %p2307_p11 = por %p2306_p9, %p2305_p2 }
 0x429   : > { %p2308_p13 = pnand %p2307_p11, %p2301_p12 }
 0x42b   : > { %2311 = shalt.err (!%p2308_p13)
}
 0x42c   : > { %s2312_s19 = scalar_lea.hbm %s1623_s12, 128  ;;  %s2316_s7 = scalar_lea.hbm %s2845_s10, 256 }
 0x42d   : > { %p2313_p1 = scmp.ne.s32.totalorder %s1623_s12, %s2312_s19  ;;  %p2317_p6 = scmp.lt.s32.totalorder %s1623_s12, %s2845_s10 }
 0x42e   : > { %p2318_p5 = scmp.lt.s32.totalorder %s2316_s7, %s2312_s19 }
 0x42f   : > { %p2314_p3 = pnand %p2313_p1, %p2873_p7 }
 0x430   : > { %p2319_p8 = por %p2318_p5, %p2317_p6 }
 0x431   : > { %p2315_p4 = pneg %p2314_p3 }
 0x433   : > { %p2320_p10 = pnand %p2319_p8, %p2315_p4 }
 0x435   : > { %2323 = shalt.err (!%p2320_p10)
}
 0x436   : > { %2055 = dma.vmem_to_hbm [thread:$0]  (%p2873_p7), %s1626_s17, 128, %s1623_s12, %s1599_s28  }
 0x437 PF: > { %s1637_s26 = sand.u32 1, %s2362_s13   ;;  %p2875_p0 = scmp.ne.s32.totalorder %s2865_s24, 0 }
 0x438   : > { %p2876_p12 = scmp.ge.s32.totalorder %s2374_s16, 2  ;;  %s1638_s30 = scalar_lea.sflag [#allocation5], %s1637_s26 }
 0x43a   : > { %p2076_p2 = pnand %p2876_p12, %p2875_p0 }
 0x43c   : > { %p2077_p9 = pneg %p2076_p2 }
 0x43e   : > { %2353 = dma.done.wait (%p2077_p9), %s1638_s30, 128  }
 0x43f   : > { %2355 = vsyncadd (%p2077_p9), %s1638_s30, 4294967168  ;;  %s1647_s23 = scalar_lea.sflag [#allocation14], %s1637_s26 }
 0x440   : > { %2357 = dma.done.wait (%p2077_p9), %s1647_s23, 128  }
 0x441   : > { %2359 = vsyncadd (%p2077_p9), %s1647_s23, 4294967168  ;;  %s2877_s22 = sld [smem:[#allocation20_spill]]  ;;  %p29_p7 = scmp.ge.s32.totalorder %s2543_s11, 4  }
 0x442   : > { %s2878_s13 = smov %s2366_s14  ;;  %s2879_s14 = smov %s2370_s15 }
 0x443   : > { %s2881_s16 = smov %s2543_s11  ;;  %31 = sbr.rel (!%p29_p7) target bundleno = 14 (0xe), region = 138 }
 0x447   : > { %s2880_s15 = smov %s2877_s22 }
 0x448   :  { %1652 = vsyncpa [#allocation4], 1 }
 0x449   :  { %1654 = vsyncpa [#allocation4 + $0x1], 1 }
 0x44a   :  { %1655 = vsyncpa [#allocation7], 1 }
 0x44b   :  { %1656 = vsyncpa [#allocation10], 1 }
 0x44c   :  { %1657 = vsyncpa [#allocation5], 1 }
 0x44d   :  { %1659 = vsyncpa [#allocation5 + $0x1], 1 }
 0x44e   :  { %1660 = vsyncpa [#allocation14], 1 }
 0x44f   :  { %1662 = vsyncpa [#allocation14 + $0x1], 1 }

</bundles_post_ra>
